<compile_context>
chip_gen: v5e
topology: v5e:2x2
jax: 0.10.0
libtpu: 0.0.40
codegen_flags: <defaults>
</compile_context>

<pallas_src>
import functools
import numpy as np
import jax
import jax.numpy as jnp
from jax.experimental import pallas as pl
from jax.experimental.pallas import tpu as pltpu


def _dense_layer_kernel(x_ref, s1_ref, b1_ref, w1_ref, w2_ref, mask_ref,
                        out_ref, *, W):
    # x_ref    : (Nb, C_in, HW)        Nb batch elements, channels x flat spatial
    # s1/b1    : (C_in, 1)             folded BN1 scale / bias
    # w1_ref   : (C_mid, C_in + 1)     s2-scaled block-diag 1x1 weight; last col = b2
    # w2_ref   : (9, C_out, C_mid)     per-tap block-diag 3x3 weights
    # mask_ref : (9, C_out, HW)        pre-broadcast per-tap border-validity masks
    # out_ref  : (Nb, C_in + C_out, HW) fused concat output
    Nb, C_in, HW = x_ref.shape
    C_out = w2_ref.shape[1]

    ones_row = jnp.ones((1, HW), jnp.float32)

    for b in range(Nb):  # static (unrolled) batch-block loop
        x = x_ref[b]                                     # (C_in, HW) f32

        # torch.cat([x_, y], dim=1): write the passthrough half directly.
        out_ref[b, 0:C_in, :] = x.astype(out_ref.dtype)

        # BN1 (folded) + ReLU; per-channel scale/bias broadcast along lanes.
        h = jnp.maximum(x * s1_ref[...] + b1_ref[...], 0.0)      # (C_in, HW)

        # grouped 1x1 conv + folded BN2 + ReLU in ONE matmul:
        # ones row contracts against the b2 column of w1'.
        h_aug = jnp.concatenate([h, ones_row], axis=0)           # (C_in+1, HW)
        mid = jnp.maximum(
            jnp.dot(w1_ref[...], h_aug, preferred_element_type=jnp.float32),
            0.0)                                                 # (C_mid, HW)

        # 3x3 grouped conv (padding=1): 9 accumulated per-tap matmuls.
        # Tap t (offset dy,dx) = mid lane-rolled by dy*W+dx; out-of-image
        # positions (incl. any circular wrap) are zeroed by the post-matmul
        # mask, which commutes with the channel contraction.
        y = jnp.zeros((C_out, HW), jnp.float32)
        t = 0
        for dy in (-1, 0, 1):
            for dx in (-1, 0, 1):
                d = dy * W + dx
                shifted = mid if d == 0 else jnp.roll(mid, -d, axis=1)
                y_tap = jnp.dot(w2_ref[t], shifted,
                                preferred_element_type=jnp.float32)  # (C_out, HW)
                y = y + y_tap * mask_ref[t]
                t += 1

        out_ref[b, C_in:C_in + C_out, :] = y.astype(out_ref.dtype)


def _pick_block_n(N):
    """Largest Nb <= 8 dividing N while keeping >= 2 grid steps (v7x megacore)."""
    if N < 2:
        return max(N, 1)
    best = 1
    for nb in range(1, min(8, N // 2) + 1):
        if N % nb == 0:
            best = nb
    return best


def dense_layer_forward(x_nchw, params, *, block_n=None):
    """_DenseLayer forward. x_nchw: (N, C_in, H, W) f32 -> (N, C_in+C_out, H, W)."""
    N, C_in, H, W = x_nchw.shape
    s1, b1, w1f, w2t, mask = params
    C_mid = w1f.shape[0]
    C_out = w2t.shape[1]
    C_tot = C_in + C_out
    HW = H * W

    # Alignment preconditions for unmasked lane-dense stores of the fused
    # concat output (perf cliff would otherwise be silent).
    assert C_in % 8 == 0 and C_tot % 8 == 0, \
        f"channel counts must be multiples of 8 (got C_in={C_in}, C_tot={C_tot})"
    assert HW % 128 == 0, f"H*W must be a multiple of 128 (got {HW})"

    Nb = _pick_block_n(N) if block_n is None else block_n
    assert N % Nb == 0, (N, Nb)

    # NCHW -> (N, C, H*W) is a pure reshape (no transpose / copy).
    x_flat = x_nchw.reshape(N, C_in, HW)

    out_flat = pl.pallas_call(
        functools.partial(_dense_layer_kernel, W=W),
        out_shape=jax.ShapeDtypeStruct((N, C_tot, HW), jnp.float32),
        grid_spec=pltpu.PrefetchScalarGridSpec(
            num_scalar_prefetch=0,
            grid=(N // Nb,),
            in_specs=[
                pl.BlockSpec((Nb, C_in, HW), lambda n: (n, 0, 0)),
                pl.BlockSpec((C_in, 1), lambda n: (0, 0)),
                pl.BlockSpec((C_in, 1), lambda n: (0, 0)),
                pl.BlockSpec((C_mid, C_in + 1), lambda n: (0, 0)),
                pl.BlockSpec((9, C_out, C_mid), lambda n: (0, 0, 0)),
                pl.BlockSpec((9, C_out, HW), lambda n: (0, 0, 0)),
            ],
            out_specs=pl.BlockSpec((Nb, C_tot, HW), lambda n: (n, 0, 0)),
        ),
        compiler_params=pltpu.CompilerParams(
            dimension_semantics=("parallel",)),
    )(x_flat, s1, b1, w1f, w2t, mask)

    # (N, C_in+C_out, H*W) -> NCHW; torch.cat already fused in the kernel.
    return out_flat.reshape(N, C_tot, H, W)


# ------------------------- parameter construction -------------------------

def _fold_bn(gamma, beta, mean, var, eps=1e-5):
    scale = gamma / jnp.sqrt(var + eps)
    bias = beta - mean * scale
    return scale.astype(jnp.float32), bias.astype(jnp.float32)   # (C,), (C,)


def _block_diag_1x1(w_torch, groups):
    # w_torch: (C_out, C_in // groups, 1, 1) -> dense (C_out, C_in)
    C_out, cin_g = w_torch.shape[0], w_torch.shape[1]
    C_in = cin_g * groups
    cout_g = C_out // groups
    dense = jnp.zeros((C_out, C_in), jnp.float32)
    for g in range(groups):
        blk = w_torch[g * cout_g:(g + 1) * cout_g, :, 0, 0]       # (cout_g, cin_g)
        dense = dense.at[g * cout_g:(g + 1) * cout_g,
                         g * cin_g:(g + 1) * cin_g].set(blk)
    return dense


def _fold_bn2_into_w1(w1_dense, s2, b2):
    # (s2 * w1) with the BN2 bias appended as an extra contraction column
    # (matched by a ones row on the activations): (C_mid, C_in) -> (C_mid, C_in+1)
    w1_scaled = s2[:, None] * w1_dense
    return jnp.concatenate([w1_scaled, b2[:, None]], axis=1).astype(jnp.float32)


def _block_diag_3x3_taps(w_torch, groups):
    # w_torch: (C_out, C_mid // groups, 3, 3) -> (9, C_out, C_mid)
    # tap t = ky*3+kx holds the block-diagonal weight of kernel position (ky, kx).
    C_out, cmid_g = w_torch.shape[0], w_torch.shape[1]
    C_mid = cmid_g * groups
    cout_g = C_out // groups
    dense = jnp.zeros((9, C_out, C_mid), jnp.float32)
    for ky in range(3):
        for kx in range(3):
            t = ky * 3 + kx
            for g in range(groups):
                blk = w_torch[g * cout_g:(g + 1) * cout_g, :, ky, kx]  # (cout_g, cmid_g)
                dense = dense.at[t,
                                 g * cout_g:(g + 1) * cout_g,
                                 g * cmid_g:(g + 1) * cmid_g].set(blk)
    return dense


def _make_tap_masks(H, W, C_out):
    # mask[t, :, h*W+w] = 1 iff the (dy, dx) neighbour of (h, w) is inside the
    # image, taps ordered (dy, dx) row-major over (-1, 0, 1)^2.  Pre-broadcast
    # along C_out so the kernel does no per-tap sublane splats.
    hh = np.arange(H)[:, None]
    ww = np.arange(W)[None, :]
    rows = []
    for dy in (-1, 0, 1):
        for dx in (-1, 0, 1):
            valid = ((hh + dy >= 0) & (hh + dy < H) &
                     (ww + dx >= 0) & (ww + dx < W))
            rows.append(valid.astype(np.float32).reshape(H * W))
    m = np.stack(rows, axis=0)                                   # (9, HW)
    m = np.broadcast_to(m[:, None, :], (9, C_out, H * W)).copy() # (9, C_out, HW)
    return jnp.asarray(m)


def build_params(bn1, w1_torch, bn2, w2_torch, group_1x1, group_3x3, H, W):
    s1, b1 = _fold_bn(*bn1)
    s2, b2 = _fold_bn(*bn2)
    w1_dense = _block_diag_1x1(w1_torch, group_1x1)              # (C_mid, C_in)
    w1f = _fold_bn2_into_w1(w1_dense, s2, b2)                    # (C_mid, C_in+1)
    w2t = _block_diag_3x3_taps(w2_torch, group_3x3)              # (9, C_out, C_mid)
    C_out = w2_torch.shape[0]
    mask = _make_tap_masks(H, W, C_out)                          # (9, C_out, HW)
    return (s1[:, None], b1[:, None], w1f, w2t, mask)


# ------------------------- pure-JAX reference -------------------------

def _ref_forward(x, bn1, w1_torch, bn2, w2_torch, g1, g3):
    def bn_relu(h, gamma, beta, mean, var, eps=1e-5):
        s = gamma / jnp.sqrt(var + eps)
        h = (h - mean[None, :, None, None]) * s[None, :, None, None] \
            + beta[None, :, None, None]
        return jnp.maximum(h, 0.0)

    h = bn_relu(x, *bn1)
    h = jax.lax.conv_general_dilated(h, w1_torch, (1, 1), 'VALID',
                                     feature_group_count=g1)
    h = bn_relu(h, *bn2)
    y = jax.lax.conv_general_dilated(h, w2_torch, (1, 1), ((1, 1), (1, 1)),
                                     feature_group_count=g3)
    return jnp.concatenate([x, y], axis=1)


if __name__ == "__main__":
    # Module-consistent small config:
    #   in_channels=8, growth_rate=8, bottleneck=4 -> C_mid=32,
    #   group_1x1=4, group_3x3=4, input (2, 8, 16, 16)
    N, C_in, H, W = 2, 8, 16, 16
    growth_rate, bottleneck = 8, 4
    group_1x1, group_3x3 = 4, 4
    C_mid = bottleneck * growth_rate          # 32
    C_out = growth_rate                       # 8

    key = jax.random.PRNGKey(0)
    ks = jax.random.split(key, 11)

    x = jax.random.normal(ks[0], (N, C_in, H, W), jnp.float32)

    # BN1 params (eval-mode running stats)
    g1w = 1.0 + 0.1 * jax.random.normal(ks[1], (C_in,), jnp.float32)
    b1w = 0.1 * jax.random.normal(ks[2], (C_in,), jnp.float32)
    m1 = 0.1 * jax.random.normal(ks[3], (C_in,), jnp.float32)
    v1 = jnp.abs(jax.random.normal(ks[4], (C_in,), jnp.float32)) + 0.5
    # BN2 params
    g2w = 1.0 + 0.1 * jax.random.normal(ks[5], (C_mid,), jnp.float32)
    b2w = 0.1 * jax.random.normal(ks[6], (C_mid,), jnp.float32)
    m2 = 0.1 * jax.random.normal(ks[7], (C_mid,), jnp.float32)
    v2 = jnp.abs(jax.random.normal(ks[8], (C_mid,), jnp.float32)) + 0.5

    # Conv weights in PyTorch layout (O, I/groups, kH, kW), no bias.
    w1_torch = 0.3 * jax.random.normal(
        ks[9], (C_mid, C_in // group_1x1, 1, 1), jnp.float32)
    w2_torch = 0.3 * jax.random.normal(
        ks[10], (C_out, C_mid // group_3x3, 3, 3), jnp.float32)

    params = build_params((g1w, b1w, m1, v1), w1_torch,
                          (g2w, b2w, m2, v2), w2_torch,
                          group_1x1, group_3x3, H, W)

    out = dense_layer_forward(x, params)
    out = jax.block_until_ready(out)

    # Verify against a pure-JAX (lax.conv) reference of the PyTorch forward.
    ref = _ref_forward(x, (g1w, b1w, m1, v1), w1_torch,
                       (g2w, b2w, m2, v2), w2_torch, group_1x1, group_3x3)
    ref = jax.block_until_ready(ref)

    assert out.shape == (N, C_in + growth_rate, H, W), out.shape
    assert jnp.allclose(out, ref, atol=1e-4, rtol=1e-4), \
        float(jnp.max(jnp.abs(out - ref)))

    print("KERNEL_OK")
</pallas_src>

<mosaic_0001>
module attributes {stable_mosaic.version = 11 : i64} {
  func.func @_dense_layer_kernel(%arg0: i32, %arg1: memref<1x8x256xf32, #tpu.memory_space<vmem>>, %arg2: memref<8x1xf32, #tpu.memory_space<vmem>>, %arg3: memref<8x1xf32, #tpu.memory_space<vmem>>, %arg4: memref<32x9xf32, #tpu.memory_space<vmem>>, %arg5: memref<9x8x32xf32, #tpu.memory_space<vmem>>, %arg6: memref<9x8x256xf32, #tpu.memory_space<vmem>>, %arg7: memref<1x16x256xf32, #tpu.memory_space<vmem>>) attributes {dimension_semantics = [#tpu.dimension_semantics<parallel>], iteration_bounds = array<i64: 2>, scalar_prefetch = 0 : i64, scratch_operands = 0 : i64, tpu.core_type = #tpu.core_type<tc>, window_params = [{transform_indices = @transform_0, window_bounds = array<i64: 1, 8, 256>}, {pipeline_mode = #tpu.pipeline_mode<synchronous>, transform_indices = @transform_1, window_bounds = array<i64: 8, 1>}, {pipeline_mode = #tpu.pipeline_mode<synchronous>, transform_indices = @transform_2, window_bounds = array<i64: 8, 1>}, {pipeline_mode = #tpu.pipeline_mode<synchronous>, transform_indices = @transform_3, window_bounds = array<i64: 32, 9>}, {pipeline_mode = #tpu.pipeline_mode<synchronous>, transform_indices = @transform_4, window_bounds = array<i64: 9, 8, 32>}, {pipeline_mode = #tpu.pipeline_mode<synchronous>, transform_indices = @transform_5, window_bounds = array<i64: 9, 8, 256>}, {transform_indices = @transform_6, window_bounds = array<i64: 1, 16, 256>}]} {
    %cst = arith.constant 1.000000e+00 : f32
    %0 = vector.broadcast %cst : f32 to vector<1x256xf32>
    %c0 = arith.constant 0 : index
    %c0_0 = arith.constant 0 : index
    %c0_1 = arith.constant 0 : index
    %1 = vector.load %arg1[%c0, %c0_0, %c0_1] : memref<1x8x256xf32, #tpu.memory_space<vmem>>, vector<1x8x256xf32>
    %2 = vector.shape_cast %1 : vector<1x8x256xf32> to vector<8x256xf32>
    %c0_2 = arith.constant 0 : index
    %c0_3 = arith.constant 0 : index
    %c0_4 = arith.constant 0 : index
    %3 = vector.load %arg7[%c0_2, %c0_3, %c0_4] : memref<1x16x256xf32, #tpu.memory_space<vmem>>, vector<1x8x256xf32>
    %4 = vector.shape_cast %3 : vector<1x8x256xf32> to vector<8x256xf32>
    %5 = vector.shape_cast %2 : vector<8x256xf32> to vector<1x8x256xf32>
    tpu.vector_store %arg7[%c0_2, %c0_3, %c0_4], %5 {strides = array<i32>} : memref<1x16x256xf32, #tpu.memory_space<vmem>>, vector<1x8x256xf32>,
    %c0_5 = arith.constant 0 : index
    %c0_6 = arith.constant 0 : index
    %6 = vector.load %arg2[%c0_5, %c0_6] : memref<8x1xf32, #tpu.memory_space<vmem>>, vector<8x1xf32>
    %7 = vector.broadcast %6 : vector<8x1xf32> to vector<8x256xf32>
    %8 = arith.mulf %2, %7 : vector<8x256xf32>
    %c0_7 = arith.constant 0 : index
    %c0_8 = arith.constant 0 : index
    %9 = vector.load %arg3[%c0_7, %c0_8] : memref<8x1xf32, #tpu.memory_space<vmem>>, vector<8x1xf32>
    %10 = vector.broadcast %9 : vector<8x1xf32> to vector<8x256xf32>
    %11 = arith.addf %8, %10 : vector<8x256xf32>
    %cst_9 = arith.constant 0.000000e+00 : f32
    %12 = vector.broadcast %cst_9 : f32 to vector<8x256xf32>
    %13 = arith.maximumf %11, %12 : vector<8x256xf32>
    %14 = tpu.concatenate %13, %0 in 0 : vector<8x256xf32>, vector<1x256xf32> -> vector<9x256xf32>
    %c0_10 = arith.constant 0 : index
    %c0_11 = arith.constant 0 : index
    %15 = vector.load %arg4[%c0_10, %c0_11] : memref<32x9xf32, #tpu.memory_space<vmem>>, vector<32x9xf32>
    %cst_12 = arith.constant dense<0.000000e+00> : vector<32x256xf32>
    %16 = tpu.matmul %15, %14, %cst_12 {dimension_numbers = #tpu.dot_dimension_numbers<[1], [0], [0], [1], [0, 0, 1, 1], [], []>} : vector<32x9xf32>, vector<9x256xf32>, vector<32x256xf32> -> vector<32x256xf32>
    %cst_13 = arith.constant 0.000000e+00 : f32
    %17 = vector.broadcast %cst_13 : f32 to vector<32x256xf32>
    %18 = arith.maximumf %16, %17 : vector<32x256xf32>
    %cst_14 = arith.constant 0.000000e+00 : f32
    %19 = vector.broadcast %cst_14 : f32 to vector<8x256xf32>
    %20 = vector.extract_strided_slice %18 {offsets = [0, 239], sizes = [32, 17], strides = [1, 1]} : vector<32x256xf32> to vector<32x17xf32>
    %21 = vector.extract_strided_slice %18 {offsets = [0, 0], sizes = [32, 239], strides = [1, 1]} : vector<32x256xf32> to vector<32x239xf32>
    %22 = tpu.concatenate %20, %21 in 1 : vector<32x17xf32>, vector<32x239xf32> -> vector<32x256xf32>
    %c0_15 = arith.constant 0 : index
    %c0_16 = arith.constant 0 : index
    %c0_17 = arith.constant 0 : index
    %23 = vector.load %arg5[%c0_15, %c0_16, %c0_17] : memref<9x8x32xf32, #tpu.memory_space<vmem>>, vector<1x8x32xf32>
    %24 = vector.shape_cast %23 : vector<1x8x32xf32> to vector<8x32xf32>
    %cst_18 = arith.constant dense<0.000000e+00> : vector<8x256xf32>
    %25 = tpu.matmul %24, %22, %cst_18 {dimension_numbers = #tpu.dot_dimension_numbers<[1], [0], [0], [1], [0, 0, 1, 1], [], []>} : vector<8x32xf32>, vector<32x256xf32>, vector<8x256xf32> -> vector<8x256xf32>
    %c0_19 = arith.constant 0 : index
    %c0_20 = arith.constant 0 : index
    %c0_21 = arith.constant 0 : index
    %26 = vector.load %arg6[%c0_19, %c0_20, %c0_21] : memref<9x8x256xf32, #tpu.memory_space<vmem>>, vector<1x8x256xf32>
    %27 = vector.shape_cast %26 : vector<1x8x256xf32> to vector<8x256xf32>
    %28 = arith.mulf %25, %27 : vector<8x256xf32>
    %29 = arith.addf %19, %28 : vector<8x256xf32>
    %30 = vector.extract_strided_slice %18 {offsets = [0, 240], sizes = [32, 16], strides = [1, 1]} : vector<32x256xf32> to vector<32x16xf32>
    %31 = vector.extract_strided_slice %18 {offsets = [0, 0], sizes = [32, 240], strides = [1, 1]} : vector<32x256xf32> to vector<32x240xf32>
    %32 = tpu.concatenate %30, %31 in 1 : vector<32x16xf32>, vector<32x240xf32> -> vector<32x256xf32>
    %c1 = arith.constant 1 : index
    %c0_22 = arith.constant 0 : index
    %c0_23 = arith.constant 0 : index
    %33 = vector.load %arg5[%c1, %c0_22, %c0_23] : memref<9x8x32xf32, #tpu.memory_space<vmem>>, vector<1x8x32xf32>
    %34 = vector.shape_cast %33 : vector<1x8x32xf32> to vector<8x32xf32>
    %cst_24 = arith.constant dense<0.000000e+00> : vector<8x256xf32>
    %35 = tpu.matmul %34, %32, %cst_24 {dimension_numbers = #tpu.dot_dimension_numbers<[1], [0], [0], [1], [0, 0, 1, 1], [], []>} : vector<8x32xf32>, vector<32x256xf32>, vector<8x256xf32> -> vector<8x256xf32>
    %c1_25 = arith.constant 1 : index
    %c0_26 = arith.constant 0 : index
    %c0_27 = arith.constant 0 : index
    %36 = vector.load %arg6[%c1_25, %c0_26, %c0_27] : memref<9x8x256xf32, #tpu.memory_space<vmem>>, vector<1x8x256xf32>
    %37 = vector.shape_cast %36 : vector<1x8x256xf32> to vector<8x256xf32>
    %38 = arith.mulf %35, %37 : vector<8x256xf32>
    %39 = arith.addf %29, %38 : vector<8x256xf32>
    %40 = vector.extract_strided_slice %18 {offsets = [0, 241], sizes = [32, 15], strides = [1, 1]} : vector<32x256xf32> to vector<32x15xf32>
    %41 = vector.extract_strided_slice %18 {offsets = [0, 0], sizes = [32, 241], strides = [1, 1]} : vector<32x256xf32> to vector<32x241xf32>
    %42 = tpu.concatenate %40, %41 in 1 : vector<32x15xf32>, vector<32x241xf32> -> vector<32x256xf32>
    %c2 = arith.constant 2 : index
    %c0_28 = arith.constant 0 : index
    %c0_29 = arith.constant 0 : index
    %43 = vector.load %arg5[%c2, %c0_28, %c0_29] : memref<9x8x32xf32, #tpu.memory_space<vmem>>, vector<1x8x32xf32>
    %44 = vector.shape_cast %43 : vector<1x8x32xf32> to vector<8x32xf32>
    %cst_30 = arith.constant dense<0.000000e+00> : vector<8x256xf32>
    %45 = tpu.matmul %44, %42, %cst_30 {dimension_numbers = #tpu.dot_dimension_numbers<[1], [0], [0], [1], [0, 0, 1, 1], [], []>} : vector<8x32xf32>, vector<32x256xf32>, vector<8x256xf32> -> vector<8x256xf32>
    %c2_31 = arith.constant 2 : index
    %c0_32 = arith.constant 0 : index
    %c0_33 = arith.constant 0 : index
    %46 = vector.load %arg6[%c2_31, %c0_32, %c0_33] : memref<9x8x256xf32, #tpu.memory_space<vmem>>, vector<1x8x256xf32>
    %47 = vector.shape_cast %46 : vector<1x8x256xf32> to vector<8x256xf32>
    %48 = arith.mulf %45, %47 : vector<8x256xf32>
    %49 = arith.addf %39, %48 : vector<8x256xf32>
    %50 = vector.extract_strided_slice %18 {offsets = [0, 255], sizes = [32, 1], strides = [1, 1]} : vector<32x256xf32> to vector<32x1xf32>
    %51 = vector.extract_strided_slice %18 {offsets = [0, 0], sizes = [32, 255], strides = [1, 1]} : vector<32x256xf32> to vector<32x255xf32>
    %52 = tpu.concatenate %50, %51 in 1 : vector<32x1xf32>, vector<32x255xf32> -> vector<32x256xf32>
    %c3 = arith.constant 3 : index
    %c0_34 = arith.constant 0 : index
    %c0_35 = arith.constant 0 : index
    %53 = vector.load %arg5[%c3, %c0_34, %c0_35] : memref<9x8x32xf32, #tpu.memory_space<vmem>>, vector<1x8x32xf32>
    %54 = vector.shape_cast %53 : vector<1x8x32xf32> to vector<8x32xf32>
    %cst_36 = arith.constant dense<0.000000e+00> : vector<8x256xf32>
    %55 = tpu.matmul %54, %52, %cst_36 {dimension_numbers = #tpu.dot_dimension_numbers<[1], [0], [0], [1], [0, 0, 1, 1], [], []>} : vector<8x32xf32>, vector<32x256xf32>, vector<8x256xf32> -> vector<8x256xf32>
    %c3_37 = arith.constant 3 : index
    %c0_38 = arith.constant 0 : index
    %c0_39 = arith.constant 0 : index
    %56 = vector.load %arg6[%c3_37, %c0_38, %c0_39] : memref<9x8x256xf32, #tpu.memory_space<vmem>>, vector<1x8x256xf32>
    %57 = vector.shape_cast %56 : vector<1x8x256xf32> to vector<8x256xf32>
    %58 = arith.mulf %55, %57 : vector<8x256xf32>
    %59 = arith.addf %49, %58 : vector<8x256xf32>
    %c4 = arith.constant 4 : index
    %c0_40 = arith.constant 0 : index
    %c0_41 = arith.constant 0 : index
    %60 = vector.load %arg5[%c4, %c0_40, %c0_41] : memref<9x8x32xf32, #tpu.memory_space<vmem>>, vector<1x8x32xf32>
    %61 = vector.shape_cast %60 : vector<1x8x32xf32> to vector<8x32xf32>
    %cst_42 = arith.constant dense<0.000000e+00> : vector<8x256xf32>
    %62 = tpu.matmul %61, %18, %cst_42 {dimension_numbers = #tpu.dot_dimension_numbers<[1], [0], [0], [1], [0, 0, 1, 1], [], []>} : vector<8x32xf32>, vector<32x256xf32>, vector<8x256xf32> -> vector<8x256xf32>
    %c4_43 = arith.constant 4 : index
    %c0_44 = arith.constant 0 : index
    %c0_45 = arith.constant 0 : index
    %63 = vector.load %arg6[%c4_43, %c0_44, %c0_45] : memref<9x8x256xf32, #tpu.memory_space<vmem>>, vector<1x8x256xf32>
    %64 = vector.shape_cast %63 : vector<1x8x256xf32> to vector<8x256xf32>
    %65 = arith.mulf %62, %64 : vector<8x256xf32>
    %66 = arith.addf %59, %65 : vector<8x256xf32>
    %67 = vector.extract_strided_slice %18 {offsets = [0, 1], sizes = [32, 255], strides = [1, 1]} : vector<32x256xf32> to vector<32x255xf32>
    %68 = vector.extract_strided_slice %18 {offsets = [0, 0], sizes = [32, 1], strides = [1, 1]} : vector<32x256xf32> to vector<32x1xf32>
    %69 = tpu.concatenate %67, %68 in 1 : vector<32x255xf32>, vector<32x1xf32> -> vector<32x256xf32>
    %c5 = arith.constant 5 : index
    %c0_46 = arith.constant 0 : index
    %c0_47 = arith.constant 0 : index
    %70 = vector.load %arg5[%c5, %c0_46, %c0_47] : memref<9x8x32xf32, #tpu.memory_space<vmem>>, vector<1x8x32xf32>
    %71 = vector.shape_cast %70 : vector<1x8x32xf32> to vector<8x32xf32>
    %cst_48 = arith.constant dense<0.000000e+00> : vector<8x256xf32>
    %72 = tpu.matmul %71, %69, %cst_48 {dimension_numbers = #tpu.dot_dimension_numbers<[1], [0], [0], [1], [0, 0, 1, 1], [], []>} : vector<8x32xf32>, vector<32x256xf32>, vector<8x256xf32> -> vector<8x256xf32>
    %c5_49 = arith.constant 5 : index
    %c0_50 = arith.constant 0 : index
    %c0_51 = arith.constant 0 : index
    %73 = vector.load %arg6[%c5_49, %c0_50, %c0_51] : memref<9x8x256xf32, #tpu.memory_space<vmem>>, vector<1x8x256xf32>
    %74 = vector.shape_cast %73 : vector<1x8x256xf32> to vector<8x256xf32>
    %75 = arith.mulf %72, %74 : vector<8x256xf32>
    %76 = arith.addf %66, %75 : vector<8x256xf32>
    %77 = vector.extract_strided_slice %18 {offsets = [0, 15], sizes = [32, 241], strides = [1, 1]} : vector<32x256xf32> to vector<32x241xf32>
    %78 = vector.extract_strided_slice %18 {offsets = [0, 0], sizes = [32, 15], strides = [1, 1]} : vector<32x256xf32> to vector<32x15xf32>
    %79 = tpu.concatenate %77, %78 in 1 : vector<32x241xf32>, vector<32x15xf32> -> vector<32x256xf32>
    %c6 = arith.constant 6 : index
    %c0_52 = arith.constant 0 : index
    %c0_53 = arith.constant 0 : index
    %80 = vector.load %arg5[%c6, %c0_52, %c0_53] : memref<9x8x32xf32, #tpu.memory_space<vmem>>, vector<1x8x32xf32>
    %81 = vector.shape_cast %80 : vector<1x8x32xf32> to vector<8x32xf32>
    %cst_54 = arith.constant dense<0.000000e+00> : vector<8x256xf32>
    %82 = tpu.matmul %81, %79, %cst_54 {dimension_numbers = #tpu.dot_dimension_numbers<[1], [0], [0], [1], [0, 0, 1, 1], [], []>} : vector<8x32xf32>, vector<32x256xf32>, vector<8x256xf32> -> vector<8x256xf32>
    %c6_55 = arith.constant 6 : index
    %c0_56 = arith.constant 0 : index
    %c0_57 = arith.constant 0 : index
    %83 = vector.load %arg6[%c6_55, %c0_56, %c0_57] : memref<9x8x256xf32, #tpu.memory_space<vmem>>, vector<1x8x256xf32>
    %84 = vector.shape_cast %83 : vector<1x8x256xf32> to vector<8x256xf32>
    %85 = arith.mulf %82, %84 : vector<8x256xf32>
    %86 = arith.addf %76, %85 : vector<8x256xf32>
    %87 = vector.extract_strided_slice %18 {offsets = [0, 16], sizes = [32, 240], strides = [1, 1]} : vector<32x256xf32> to vector<32x240xf32>
    %88 = vector.extract_strided_slice %18 {offsets = [0, 0], sizes = [32, 16], strides = [1, 1]} : vector<32x256xf32> to vector<32x16xf32>
    %89 = tpu.concatenate %87, %88 in 1 : vector<32x240xf32>, vector<32x16xf32> -> vector<32x256xf32>
    %c7 = arith.constant 7 : index
    %c0_58 = arith.constant 0 : index
    %c0_59 = arith.constant 0 : index
    %90 = vector.load %arg5[%c7, %c0_58, %c0_59] : memref<9x8x32xf32, #tpu.memory_space<vmem>>, vector<1x8x32xf32>
    %91 = vector.shape_cast %90 : vector<1x8x32xf32> to vector<8x32xf32>
    %cst_60 = arith.constant dense<0.000000e+00> : vector<8x256xf32>
    %92 = tpu.matmul %91, %89, %cst_60 {dimension_numbers = #tpu.dot_dimension_numbers<[1], [0], [0], [1], [0, 0, 1, 1], [], []>} : vector<8x32xf32>, vector<32x256xf32>, vector<8x256xf32> -> vector<8x256xf32>
    %c7_61 = arith.constant 7 : index
    %c0_62 = arith.constant 0 : index
    %c0_63 = arith.constant 0 : index
    %93 = vector.load %arg6[%c7_61, %c0_62, %c0_63] : memref<9x8x256xf32, #tpu.memory_space<vmem>>, vector<1x8x256xf32>
    %94 = vector.shape_cast %93 : vector<1x8x256xf32> to vector<8x256xf32>
    %95 = arith.mulf %92, %94 : vector<8x256xf32>
    %96 = arith.addf %86, %95 : vector<8x256xf32>
    %97 = vector.extract_strided_slice %18 {offsets = [0, 17], sizes = [32, 239], strides = [1, 1]} : vector<32x256xf32> to vector<32x239xf32>
    %98 = vector.extract_strided_slice %18 {offsets = [0, 0], sizes = [32, 17], strides = [1, 1]} : vector<32x256xf32> to vector<32x17xf32>
    %99 = tpu.concatenate %97, %98 in 1 : vector<32x239xf32>, vector<32x17xf32> -> vector<32x256xf32>
    %c8 = arith.constant 8 : index
    %c0_64 = arith.constant 0 : index
    %c0_65 = arith.constant 0 : index
    %100 = vector.load %arg5[%c8, %c0_64, %c0_65] : memref<9x8x32xf32, #tpu.memory_space<vmem>>, vector<1x8x32xf32>
    %101 = vector.shape_cast %100 : vector<1x8x32xf32> to vector<8x32xf32>
    %cst_66 = arith.constant dense<0.000000e+00> : vector<8x256xf32>
    %102 = tpu.matmul %101, %99, %cst_66 {dimension_numbers = #tpu.dot_dimension_numbers<[1], [0], [0], [1], [0, 0, 1, 1], [], []>} : vector<8x32xf32>, vector<32x256xf32>, vector<8x256xf32> -> vector<8x256xf32>
    %c8_67 = arith.constant 8 : index
    %c0_68 = arith.constant 0 : index
    %c0_69 = arith.constant 0 : index
    %103 = vector.load %arg6[%c8_67, %c0_68, %c0_69] : memref<9x8x256xf32, #tpu.memory_space<vmem>>, vector<1x8x256xf32>
    %104 = vector.shape_cast %103 : vector<1x8x256xf32> to vector<8x256xf32>
    %105 = arith.mulf %102, %104 : vector<8x256xf32>
    %106 = arith.addf %96, %105 : vector<8x256xf32>
    %c0_70 = arith.constant 0 : index
    %c8_71 = arith.constant 8 : index
    %c0_72 = arith.constant 0 : index
    %107 = vector.load %arg7[%c0_70, %c8_71, %c0_72] : memref<1x16x256xf32, #tpu.memory_space<vmem>>, vector<1x8x256xf32>
    %108 = vector.shape_cast %107 : vector<1x8x256xf32> to vector<8x256xf32>
    %109 = vector.shape_cast %106 : vector<8x256xf32> to vector<1x8x256xf32>
    tpu.vector_store %arg7[%c0_70, %c8_71, %c0_72], %109 {strides = array<i32>} : memref<1x16x256xf32, #tpu.memory_space<vmem>>, vector<1x8x256xf32>,
    return
  }
  func.func @transform_0(%arg0: i32) -> (i32, i32, i32) {
    %c0_i32 = arith.constant 0 : i32
    %c0_i32_0 = arith.constant 0 : i32
    %c0_i32_1 = arith.constant 0 : i32
    return %arg0, %c0_i32, %c0_i32_0 : i32, i32, i32
  }
  func.func @transform_1(%arg0: i32) -> (i32, i32) {
    %c0_i32 = arith.constant 0 : i32
    %c0_i32_0 = arith.constant 0 : i32
    %c0_i32_1 = arith.constant 0 : i32
    return %c0_i32, %c0_i32_0 : i32, i32
  }
  func.func @transform_2(%arg0: i32) -> (i32, i32) {
    %c0_i32 = arith.constant 0 : i32
    %c0_i32_0 = arith.constant 0 : i32
    %c0_i32_1 = arith.constant 0 : i32
    return %c0_i32, %c0_i32_0 : i32, i32
  }
  func.func @transform_3(%arg0: i32) -> (i32, i32) {
    %c0_i32 = arith.constant 0 : i32
    %c0_i32_0 = arith.constant 0 : i32
    %c0_i32_1 = arith.constant 0 : i32
    return %c0_i32, %c0_i32_0 : i32, i32
  }
  func.func @transform_4(%arg0: i32) -> (i32, i32, i32) {
    %c0_i32 = arith.constant 0 : i32
    %c0_i32_0 = arith.constant 0 : i32
    %c0_i32_1 = arith.constant 0 : i32
    %c0_i32_2 = arith.constant 0 : i32
    return %c0_i32, %c0_i32_0, %c0_i32_1 : i32, i32, i32
  }
  func.func @transform_5(%arg0: i32) -> (i32, i32, i32) {
    %c0_i32 = arith.constant 0 : i32
    %c0_i32_0 = arith.constant 0 : i32
    %c0_i32_1 = arith.constant 0 : i32
    %c0_i32_2 = arith.constant 0 : i32
    return %c0_i32, %c0_i32_0, %c0_i32_1 : i32, i32, i32
  }
  func.func @transform_6(%arg0: i32) -> (i32, i32, i32) {
    %c0_i32 = arith.constant 0 : i32
    %c0_i32_0 = arith.constant 0 : i32
    %c0_i32_1 = arith.constant 0 : i32
    return %arg0, %c0_i32, %c0_i32_0 : i32, i32, i32
  }
}

</mosaic_0001>

<bundles_post_ra>
// kernel: tpu_custom_call.1
= control target key start
LH: loop header
LB: loop body
LE: loop exit
PB: predicated region body
PF: predicated region fallthrough
CT: control target
= control target key end

     0   :  { %11 = vsyncpa [#allocation3], 0  ;;  %s2028_s0 = inlined_call_operand.vmem [shape: f32[2,8,256], index: 0, kind: input, shape index: {}]   ;;  %s2029_s1 = inlined_call_operand.vmem [shape: f32[8,1], index: 1, kind: input, shape index: {}]   ;;  %s2030_s2 = inlined_call_operand.vmem [shape: f32[8,1], index: 2, kind: input, shape index: {}]   ;;  %s2031_s3 = inlined_call_operand.vmem [shape: f32[32,9], index: 3, kind: input, shape index: {}]   ;;  %s2032_s4 = inlined_call_operand.hbm [shape: f32[9,8,32], index: 4, kind: input, shape index: {}]   ;;  %s2033_s5 = inlined_call_operand.hbm [shape: f32[9,8,256], index: 5, kind: input, shape index: {}]   ;;  %s2034_s6 = inlined_call_operand.hbm [shape: f32[2,16,256], index: 6, kind: output, shape index: {}]  }
   0x1   :  { %12 = vsyncpa [#allocation6], 0 }
   0x2   :  { %13 = vsyncpa [#allocation4], 0 }
   0x3   :  { %15 = vsyncpa [#allocation4 + $0x1], 0  ;;  %s1732_s21 = smov 0   ;;  %s1734_s22 = smov 0  }
   0x4   :  { %s1736_s23 = smov 0   ;;  %s1738_s24 = smov 0  }
   0x5 LB: > { %s1753_s25 = sadd.s32 4294967295, %s1678_s24   ;;  %s1266_s26 = sadd.s32 4294967294, %s1678_s24   ;;  %s1678_s24 = sphi %s1738_s24, %s2041_s24   ;;  %s1674_s23 = sphi %s1736_s23, %s2040_s23   ;;  %s1670_s22 = sphi %s1734_s22, %s2039_s22   ;;  %s1666_s21 = sphi %s1732_s21, %s2038_s21  }
   0x6   : > { %s1757_s27 = sadd.s32 1, %s1678_s24   ;;  %s159_s28 = sadd.s32 1, %s1674_s23 }
   0x7   : > { %s156_s29 = ssub.s32 %s1678_s24, %s1757_s27  ;;  %p169_p0 = scmp.ne.s32.totalorder %s1674_s23, %s1670_s22 }
   0x8   : > { %p157_p1 = scmp.eq.s32.totalorder %s156_s29, 0  ;;  %p170_p2 = scmp.eq.s32.totalorder %s1753_s25, 1 }
   0x9   : > { %p175_p3 = scmp.ne.s32.totalorder %s1670_s22, %s1666_s21  ;;  %p176_p4 = scmp.eq.s32.totalorder %s1266_s26, 1 }
   0xa   : > { %s1768_s30 = scalar_select %p157_p1, %s1674_s23, %s159_s28  }
   0xb   : > { %p1770_p5 = por %p170_p2, %p169_p0  ;;  %p1774_p6 = por %p176_p4, %p175_p3 }
   0xc   : > { %p1267_p7 = scmp.ge.s32.totalorder %s1678_s24, 1  ;;  %p183_p8 = scmp.lt.s32.totalorder %s1678_s24, 3 }
   0xd   : > { %p1333_p9 = scmp.eq.s32.totalorder %s1753_s25, 0  ;;  %s203_s12 = sshll.u32 %s2032_s4, 4  ;;  %s204_s12 = int_to_ptr.hbm [resolvable:$true] %s203_s12 }
   0xe   : > { %p1781_p10 = pnand %p1267_p7, %p183_p8  ;;  %s1680_s13 = smov [#allocation2]  }
   0xf   : > { %s205_s14 = sshll.u32 %s1680_s13, 4  ;;  %s217_s17 = sshll.u32 %s2033_s5, 4  ;;  %s206_s14 = int_to_ptr.vmem [resolvable:$true] %s205_s14  ;;  %s218_s17 = int_to_ptr.hbm [resolvable:$true] %s217_s17 }
  0x10   : > { %p1322_p11 = pneg %p1781_p10  ;;  %s1681_s18 = smov 128  }
  0x11   : > { %s1682_s19 = smov 8   ;;  %s1683_s20 = smov [#allocation5]  }
  0x12   : > { %p1323_p12 = pnand %p1333_p9, %p1322_p11  ;;  %s219_s26 = sshll.u32 %s1683_s20, 4  ;;  %s220_s26 = int_to_ptr.vmem [resolvable:$true] %s219_s26 }
  0x13   : > { %s1684_s28 = smov 256   ;;  %s1685_s29 = smov 16  }
  0x14   : > { %1325 = dma.hbm_to_vmem [thread:$0]  (!%p1323_p12), %s204_s12, 1152, %s206_s14, [#allocation3], %s1681_s18, %s1681_s18, %s1682_s19  }
  0x15   : > { %1328 = dma.hbm_to_vmem [thread:$0]  (!%p1323_p12), %s218_s17, 2304, %s220_s26, [#allocation6], %s1684_s28, %s1684_s28, %s1685_s29  }
  0x16   : > { %243 = sbr.rel (%p1781_p10) target bundleno = 636 (0x27c), region = 44 }
  0x1b   : > { %1653 = dma.done.wait (%p1333_p9), [#allocation3], 1152  }
  0x1c   : > { %1655 = vsyncadd (%p1333_p9), [#allocation3], 4294966144 }
  0x1d   : > { %1657 = dma.done.wait (%p1333_p9), [#allocation6], 2304  }
  0x1e   : > { %1659 = vsyncadd (%p1333_p9), [#allocation6], 4294964992  ;;  %v1686_v0 = vmov 0   ;;  %v288_v1 = vld [vmem:[%s2029_s1] sm:$0xff]  ;;  %p279_p13 = scmp.lt.s32.totalorder %s1753_s25, 1  ;;  %s276_s14 = sand.u32 1, %s1670_s22  }
  0x1f   : > { %1387 = vset.pattern.permute.xlu0 %v1686_v0  ;;  %v296_v2 = vld [vmem:[%s2030_s2] sm:$0xff]  ;;  %s1274_s16 = sshll.u32 %s276_s14, 5  ;;  %vm323_vm0 = vcmask 1040384   ;;  %v1687_v5 = vmov 1.0   ;;  %vm310_vm1 = vcmask 72704   ;;  %v307_v15 = vld [vmem:[%s2031_s3 + $0x8] sm:$0xff] }
  0x20   : > { %291 = vperm.xlu0 %1387, %v288_v1   ;;  %s280_s13 = scalar_select %p279_p13, %s1753_s25, 1  ;;  %1277 = vmatpush.msk.msra.mxu0 %vm323_vm0, %v1687_v5  ;;  %v306_v14 = vld [vmem:[%s2031_s3] sm:$0xff]  ;;  %v308_v16 = vld [vmem:[%s2031_s3 + $0x10] sm:$0xff]  ;;  %v309_v17 = vld [vmem:[%s2031_s3 + $0x18] sm:$0xff]  ;;  %vm421_vm2 = vcmask 138240   ;;  %vm439_vm3 = vcmask 261120  }
  0x21   : > { %s1819_s20 = scalar_lea.vmem [#allocation7], %s1274_s16  ;;  %1282 = vmatpush.msk.msra.mxu1 %vm323_vm0, %v1687_v5  ;;  %s1689_s16 = smov 16   ;;  %vm509_vm4 = vcmask 130048   ;;  %vm598_vm5 = vcmask 121856   ;;  %vm687_vm6 = vcmask 7168   ;;  %vm824_vm7 = vcmask 1039360  }
  0x22   : > { %s1310_s15 = sshll.u32 %s280_s13, 4  ;;  %s1690_s17 = smov 17   ;;  %vm1002_vm8 = vcmask 916480   ;;  %vm913_vm9 = vcmask 924672   ;;  %vm1091_vm10 = vcmask 908288  }
  0x23   : > { %s283_s19 = scalar_lea.vmem %s2028_s0, %s1310_s15  ;;  %s1688_s15 = smov 15  }
  0x24   : > { %v284_v3 = vld [vmem:[%s283_s19] sm:$0xff]  ;;  %v285_v4 = vld [vmem:[%s283_s19 + $0x8] sm:$0xff]  ;;  %s1691_s18 = smov 1   ;;  %s1692_s19 = smov 127  }
  0x25   : > { %286 = vst [vmem:[%s1819_s20] sm:$0xff] %v284_v3  ;;  %s1693_s26 = smov 113   ;;  %s1694_s28 = smov 112  }
  0x26   : > { %287 = vst [vmem:[%s1819_s20 + $0x8] sm:$0xff] %v285_v4  ;;  %s1695_s29 = smov 111   ;;  %s1311_s9 = sshll.u32 %s1753_s25, 5 }
  0x27   : > { %s1178_s12 = scalar_lea.hbm %s2034_s6, %s1311_s9  ;;  %s1179_s13 = sshll.u32 %s1819_s20, 4  ;;  %s1180_s13 = int_to_ptr.vmem [resolvable:$true] %s1179_s13 }
  0x28   : > { %299 = vperm.xlu0 %1387, %v296_v2   ;;  %s1181_s25 = sshll.u32 %s1178_s12, 4  ;;  %s1182_s25 = int_to_ptr.hbm [resolvable:$true] %s1181_s25 }
  0x92   : > { %v292_v6 = vpop.permute.xlu0 %291 }
  0x93   : > { %v294_v7 = vmul.f32 %v292_v6, %v284_v3  ;;  %v295_v8 = vmul.f32 %v292_v6, %v285_v4 }
  0x9a   : > { %v300_v9 = vpop.permute.xlu0 %299 }
  0x9b   : > { %v302_v10 = vadd.f32 %v300_v9, %v294_v7  ;;  %v303_v11 = vadd.f32 %v300_v9, %v295_v8 }
  0x9d   : > { %v304_v12 = vmax.f32 %v302_v10, 0.0  ;;  %v305_v13 = vmax.f32 %v303_v11, 0.0  ;;  %v438_v10 = vld [vmem:[#allocation2] sm:$0xff] }
  0x9f   : > { %342 = vmatpush.msra.mxu0 %v304_v12  ;;  %371 = vmatpush.msra.mxu1 %v305_v13 }
  0xa0   : > { %1278 = vmatmul.msk.f32.vlgmr.msra.gmra.mxu0 %vm310_vm1, %v306_v14  ;;  %1283 = vmatmul.msk.f32.vlgmr.msra.gmra.mxu1 %vm310_vm1, %v306_v14 }
  0xa8   : > { %1279 = vmatmul.msk.f32.gmra.mxu0 %vm310_vm1, %v307_v15  ;;  %1284 = vmatmul.msk.f32.gmra.mxu1 %vm310_vm1, %v307_v15  ;;  %v757_v15 = vld [vmem:[#allocation2 + $0x20] sm:$0xff] }
  0xb0   : > { %1280 = vmatmul.msk.f32.gmra.mxu0 %vm310_vm1, %v308_v16  ;;  %1285 = vmatmul.msk.f32.gmra.mxu1 %vm310_vm1, %v308_v16 }
  0xb8   : > { %1281 = vmatmul.msk.f32.gmra.mxu0 %vm310_vm1, %v309_v17  ;;  %1286 = vmatmul.msk.f32.gmra.mxu1 %vm310_vm1, %v309_v17 }
 0x11d   : > { %v344_v18 = vpop.f32.mrf.mxu0  ;;  %v373_v19 = vpop.f32.mrf.mxu1 }
 0x11e   : > { %v385_v20 = vmax.f32 %v344_v18, 0.0  ;;  %v386_v21 = vmax.f32 %v373_v19, 0.0 }
 0x120   : > { %v1398_v22 = vpack.i.bf16 %v385_v20, %v386_v21  ;;  %v1835_v23 = vpack.i.bf16 %v386_v21, %v385_v20 }
 0x122   : > { %1399 = vrot.lane.b32.xlu1 %v1398_v22, %s1688_s15  ;;  %1394 = vrot.lane.b32.xlu0 %v1398_v22, %s1689_s16 }
 0x123   : > { %1389 = vrot.lane.b32.xlu2 %v1398_v22, %s1690_s17 }
 0x125   : > { %v347_v24 = vpop.f32.mrf.mxu0  ;;  %v376_v25 = vpop.f32.mrf.mxu1 }
 0x126   : > { %v387_v26 = vmax.f32 %v347_v24, 0.0  ;;  %v388_v27 = vmax.f32 %v376_v25, 0.0 }
 0x128   : > { %v1413_v28 = vpack.i.bf16 %v387_v26, %v388_v27  ;;  %v1538_v29 = vpack.i.bf16 %v388_v27, %v387_v26 }
 0x12a   : > { %1414 = vrot.lane.b32.xlu0 %v1413_v28, %s1688_s15 }
 0x12b   : > { %1404 = vrot.lane.b32.xlu2 %v1413_v28, %s1690_s17 }
 0x12d   : > { %v350_v30 = vpop.f32.mrf.mxu0  ;;  %v379_v31 = vpop.f32.mrf.mxu1 }
 0x12e   : > { %v389_v32 = vmax.f32 %v350_v30, 0.0  ;;  %v390_v33 = vmax.f32 %v379_v31, 0.0  ;;  %v527_v31 = vld [vmem:[#allocation2 + $0x8] sm:$0xff] }
 0x130   : > { %v1433_v34 = vpack.i.bf16 %v389_v32, %v390_v33  ;;  %v1533_v35 = vpack.i.bf16 %v390_v33, %v389_v32 }
 0x132   : > { %1434 = vrot.lane.b32.xlu0 %v1433_v34, %s1691_s18  ;;  %1419 = vrot.lane.b32.xlu1 %v1433_v34, %s1690_s17 }
 0x133   : > { %1409 = vrot.lane.b32.xlu2 %v1413_v28, %s1689_s16 }
 0x135   : > { %v353_v36 = vpop.f32.mrf.mxu0  ;;  %v382_v37 = vpop.f32.mrf.mxu1 }
 0x136   : > { %v391_v38 = vmax.f32 %v353_v36, 0.0  ;;  %v392_v39 = vmax.f32 %v382_v37, 0.0 }
 0x138   : > { %773 = vmatpush.msrb.mxu0 %v391_v38  ;;  %793 = vmatpush.msrb.mxu1 %v392_v39  ;;  %v1453_v40 = vpack.i.bf16 %v391_v38, %v392_v39  ;;  %v1498_v41 = vpack.i.bf16 %v392_v39, %v391_v38 }
 0x13a   : > { %794 = vmatpush.msrb.mxu1 %v390_v33  ;;  %1424 = vrot.lane.b32.xlu1 %v1433_v34, %s1689_s16 }
 0x13b   : > { %1429 = vrot.lane.b32.xlu2 %v1433_v34, %s1688_s15  ;;  %1454 = vrot.lane.b32.xlu0 %v1453_v40, %s1689_s16 }
 0x13c   : > { %774 = vmatpush.msrb.mxu0 %v389_v32  ;;  %795 = vmatpush.msrb.mxu1 %v388_v27 }
 0x13e   : > { %775 = vmatpush.msrb.mxu0 %v387_v26  ;;  %796 = vmatpush.msrb.mxu1 %v386_v21 }
 0x13f   : > { %1296 = vmatmul.msk.f32.vlgmr.msrb.gmra.mxu1 %vm439_vm3, %v757_v15 }
 0x140   : > { %776 = vmatpush.msrb.mxu0 %v385_v20 }
 0x141   : > { %1295 = vmatmul.msk.f32.vlgmr.msrb.gmra.mxu0 %vm439_vm3, %v757_v15 }
 0x142   : > { %1439 = vrot.lane.b32.xlu1 %v1453_v40, %s1690_s17  ;;  %s1622_s17 = sshra.s32 %s1182_s25, 4  ;;  %s1623_s17 = int_to_ptr.hbm [resolvable:$true] %s1622_s17 }
 0x143   : > { %1449 = vrot.lane.b32.xlu2 %v1398_v22, %s1691_s18  ;;  %1474 = vrot.lane.b32.xlu0 %v1835_v23, %s1692_s19  ;;  %p1629_p3 = scmp.lt.s32.totalorder %s1623_s17, %s2034_s6 }
 0x14a   : > { %1444 = vrot.lane.b32.xlu1 %v1413_v28, %s1691_s18 }
 0x14b   : > { %1469 = vrot.lane.b32.xlu2 %v1538_v29, %s1692_s19  ;;  %1479 = vrot.lane.b32.xlu0 %v1533_v35, %s1693_s26 }
 0x152   : > { %1459 = vrot.lane.b32.xlu1 %v1453_v40, %s1688_s15  ;;  %s1167_s15 = scalar_lea.sflag [#allocation4], %s276_s14 }
 0x153   : > { %1489 = vrot.lane.b32.xlu2 %v1453_v40, %s1691_s18  ;;  %1499 = vrot.lane.b32.xlu0 %v1498_v41, %s1692_s19  ;;  %s1624_s18 = scalar_lea.hbm %s1623_s17, 32 }
 0x154   : > { %p1625_p0 = scmp.ne.s32.totalorder %s1623_s17, %s1624_s18 }
 0x156   : > { %p1626_p1 = pnand %p1625_p0, %p1770_p5 }
 0x158   : > { %p1627_p2 = pneg %p1626_p1 }
 0x15a   : > { %1464 = vrot.lane.b32.xlu1 %v1533_v35, %s1692_s19 }
 0x15b   : > { %1494 = vrot.lane.b32.xlu2 %v1538_v29, %s1693_s26  ;;  %1504 = vrot.lane.b32.xlu0 %v1538_v29, %s1694_s28 }
 0x162   : > { %1484 = vrot.lane.b32.xlu1 %v1533_v35, %s1694_s28 }
 0x163   : > { %1519 = vrot.lane.b32.xlu2 %v1498_v41, %s1694_s28  ;;  %1529 = vrot.lane.b32.xlu0 %v1498_v41, %s1695_s29 }
 0x16a   : > { %1509 = vrot.lane.b32.xlu1 %v1498_v41, %s1693_s26 }
 0x16b   : > { %1524 = vrot.lane.b32.xlu2 %v1835_v23, %s1694_s28  ;;  %1544 = vrot.lane.b32.xlu0 %v1835_v23, %s1695_s29  ;;  %s1628_s28 = scalar_lea.hbm %s2034_s6, 64 }
 0x16c   : > { %p1630_p4 = scmp.lt.s32.totalorder %s1628_s28, %s1624_s18 }
 0x16e   : > { %p1631_p7 = por %p1630_p4, %p1629_p3 }
 0x170   : > { %p1632_p8 = pnand %p1631_p7, %p1627_p2 }
 0x172   : > { %1514 = vrot.lane.b32.xlu1 %v1835_v23, %s1693_s26 }
 0x173   : > { %1539 = vrot.lane.b32.xlu2 %v1538_v29, %s1695_s29 }
 0x17a   : > { %1534 = vrot.lane.b32.xlu1 %v1533_v35, %s1695_s29 }
 0x17d   : > { %v1390_v42 = vpop.permute.xlu2 %1389 }
 0x17e   : > { %v1392_v0 = vunpack.i.h.bf16 %v1390_v42  ;;  %v1391_v1 = vunpack.i.l.bf16 %v1390_v42 }
 0x180   : > { %v434_v13 = vsel %vm421_vm2, %v1391_v1, %v1392_v0  ;;  %v422_v14 = vsel %vm421_vm2, %v1392_v0, %v1391_v1 }
 0x185   : > { %v1405_v43 = vpop.permute.xlu2 %1404 }
 0x186   : > { %v1407_v60 = vunpack.i.h.bf16 %v1405_v43  ;;  %v1406_v61 = vunpack.i.l.bf16 %v1405_v43 }
 0x188   : > { %v435_v7 = vsel %vm421_vm2, %v1406_v61, %v1407_v60  ;;  %v423_v8 = vsel %vm421_vm2, %v1407_v60, %v1406_v61 }
 0x18d   : > { %v1859_v45 = vpop.permute.xlu2 %1409 }
 0x18e   : > { %v1412_v16 = vunpack.i.h.bf16 %v1859_v45  ;;  %v1411_v17 = vunpack.i.l.bf16 %v1859_v45 }
 0x190   : > { %v523_v25 = vsel %vm509_vm4, %v1411_v17, %v1412_v16  ;;  %v511_v26 = vsel %vm509_vm4, %v1412_v16, %v1411_v17 }
 0x194   : > { %v1857_v44 = vpop.permute.xlu0 %1394  ;;  %v1861_v46 = vpop.permute.xlu1 %1399 }
 0x195   : > { %v1865_v48 = vpop.permute.xlu2 %1429  ;;  %v1397_v21 = vunpack.i.h.bf16 %v1857_v44  ;;  %v1396_v22 = vunpack.i.l.bf16 %v1857_v44  ;;  %v1402_v40 = vunpack.i.h.bf16 %v1861_v46  ;;  %v1401_v41 = vunpack.i.l.bf16 %v1861_v46  ;;  %v616_v46 = vld [vmem:[#allocation2 + $0x10] sm:$0xff] }
 0x196   : > { %v1432_v27 = vunpack.i.h.bf16 %v1865_v48  ;;  %v1431_v28 = vunpack.i.l.bf16 %v1865_v48 }
 0x197   : > { %v522_v34 = vsel %vm509_vm4, %v1396_v22, %v1397_v21  ;;  %v510_v35 = vsel %vm509_vm4, %v1397_v21, %v1396_v22 }
 0x198   : > { %v613_v43 = vsel %vm598_vm5, %v1431_v28, %v1432_v27  ;;  %v601_v44 = vsel %vm598_vm5, %v1432_v27, %v1431_v28 }
 0x19c   : > { %v1863_v47 = vpop.permute.xlu0 %1414 }
 0x19d   : > { %v1869_v51 = vpop.permute.xlu2 %1449  ;;  %v1417_v36 = vunpack.i.h.bf16 %v1863_v47  ;;  %v1416_v37 = vunpack.i.l.bf16 %v1863_v47 }
 0x19f   : > { %v612_v48 = vsel %vm598_vm5, %v1416_v37, %v1417_v36 }
 0x1a4   : > { %v1420_v49 = vpop.permute.xlu1 %1419  ;;  %v1867_v50 = vpop.permute.xlu0 %1434 }
 0x1a5   : > { %v1871_v55 = vpop.permute.xlu2 %1469  ;;  %v1422_v56 = vunpack.i.h.bf16 %v1420_v49  ;;  %v1421_v57 = vunpack.i.l.bf16 %v1420_v49  ;;  %v600_v49 = vsel %vm598_vm5, %v1417_v36, %v1416_v37 }
 0x1a7   : > { %v436_v2 = vsel %vm421_vm2, %v1421_v57, %v1422_v56  ;;  %v424_v3 = vsel %vm421_vm2, %v1422_v56, %v1421_v57  ;;  %v611_v56 = vsel %vm598_vm5, %v1401_v41, %v1402_v40  ;;  %v599_v57 = vsel %vm598_vm5, %v1402_v40, %v1401_v41 }
 0x1ac   : > { %v1425_v52 = vpop.permute.xlu1 %1424 }
 0x1ad   : > { %v1455_v53 = vpop.permute.xlu0 %1454  ;;  %v1427_v11 = vunpack.i.h.bf16 %v1425_v52  ;;  %v1426_v12 = vunpack.i.l.bf16 %v1425_v52  ;;  %v1887_v18 = vpop.permute.xlu2 %1489 }
 0x1ae   : > { %v1457_v5 = vunpack.i.h.bf16 %v1455_v53  ;;  %v1456_v6 = vunpack.i.l.bf16 %v1455_v53  ;;  %v1492_v45 = vunpack.i.h.bf16 %v1887_v18  ;;  %v1491_v47 = vunpack.i.l.bf16 %v1887_v18 }
 0x1af   : > { %v524_v23 = vsel %vm509_vm4, %v1426_v12, %v1427_v11  ;;  %v512_v24 = vsel %vm509_vm4, %v1427_v11, %v1426_v12  ;;  %v1437_v53 = vunpack.i.h.bf16 %v1867_v50  ;;  %v705_v12 = vld [vmem:[#allocation2 + $0x18] sm:$0xff] }
 0x1b0   : > { %v525_v19 = vsel %vm509_vm4, %v1456_v6, %v1457_v5  ;;  %v513_v20 = vsel %vm509_vm4, %v1457_v5, %v1456_v6  ;;  %v703_v61 = vsel %vm687_vm6, %v1491_v47, %v1492_v45 }
 0x1b4   : > { %v1440_v54 = vpop.permute.xlu1 %1439 }
 0x1b5   : > { %v1442_v58 = vunpack.i.h.bf16 %v1440_v54  ;;  %v1441_v59 = vunpack.i.l.bf16 %v1440_v54  ;;  %v1877_v4 = vpop.permute.xlu0 %1474  ;;  %v1915_v42 = vpop.permute.xlu2 %1494  ;;  %v1436_v54 = vunpack.i.l.bf16 %v1867_v50  ;;  %v691_v50 = vsel %vm687_vm6, %v1492_v45, %v1491_v47 }
 0x1b6   : > { %v1477_v17 = vunpack.i.h.bf16 %v1877_v4  ;;  %v1476_v18 = vunpack.i.l.bf16 %v1877_v4 }
 0x1b7   : > { %v437_v62 = vsel %vm421_vm2, %v1441_v59, %v1442_v58  ;;  %v425_v63 = vsel %vm421_vm2, %v1442_v58, %v1441_v59  ;;  %v702_v0 = vsel %vm687_vm6, %v1436_v54, %v1437_v53  ;;  %v690_v1 = vsel %vm687_vm6, %v1437_v53, %v1436_v54 }
 0x1b8   : > { %455 = vmatpush.msra.mxu2 %v437_v62  ;;  %475 = vmatpush.msra.mxu3 %v425_v63  ;;  %v1452_v62 = vunpack.i.h.bf16 %v1869_v51  ;;  %v1451_v63 = vunpack.i.l.bf16 %v1869_v51  ;;  %v825_v27 = vsel %vm824_vm7, %v1476_v18, %v1477_v17  ;;  %v841_v28 = vsel %vm824_vm7, %v1477_v17, %v1476_v18  ;;  %v1113_v18 = vld [vmem:[#allocation2 + $0x40] sm:$0xff] }
 0x1ba   : > { %456 = vmatpush.msra.mxu2 %v436_v2  ;;  %476 = vmatpush.msra.mxu3 %v424_v3  ;;  %v700_v51 = vsel %vm687_vm6, %v1451_v63, %v1452_v62  ;;  %v688_v11 = vsel %vm687_vm6, %v1452_v62, %v1451_v63 }
 0x1bc   : > { %v1881_v9 = vpop.permute.xlu1 %1444  ;;  %457 = vmatpush.msra.mxu2 %v435_v7  ;;  %477 = vmatpush.msra.mxu3 %v423_v8 }
 0x1bd   : > { %v1903_v29 = vpop.permute.xlu0 %1479  ;;  %v1447_v59 = vunpack.i.h.bf16 %v1881_v9  ;;  %v1446_v60 = vunpack.i.l.bf16 %v1881_v9  ;;  %v1520_v5 = vpop.permute.xlu2 %1519 }
 0x1be   : > { %458 = vmatpush.msra.mxu2 %v434_v13  ;;  %478 = vmatpush.msra.mxu3 %v422_v14  ;;  %v1472_v13 = vunpack.i.h.bf16 %v1871_v55  ;;  %v1471_v14 = vunpack.i.l.bf16 %v1871_v55  ;;  %v1522_v21 = vunpack.i.h.bf16 %v1520_v5  ;;  %v1521_v22 = vunpack.i.l.bf16 %v1520_v5 }
 0x1bf   : > { %1287 = vmatmul.msk.f32.vlgmr.msra.gmra.mxu2 %vm439_vm3, %v438_v10  ;;  %1288 = vmatmul.msk.f32.vlgmr.msra.gmra.mxu3 %vm439_vm3, %v438_v10  ;;  %v701_v6 = vsel %vm687_vm6, %v1446_v60, %v1447_v59  ;;  %v689_v7 = vsel %vm687_vm6, %v1447_v59, %v1446_v60 }
 0x1c0   : > { %543 = vmatpush.msrb.mxu2 %v525_v19  ;;  %563 = vmatpush.msrb.mxu3 %v513_v20 }
 0x1c2   : > { %544 = vmatpush.msrb.mxu2 %v524_v23  ;;  %564 = vmatpush.msrb.mxu3 %v512_v24  ;;  %v826_v23 = vsel %vm824_vm7, %v1471_v14, %v1472_v13  ;;  %v842_v24 = vsel %vm824_vm7, %v1472_v13, %v1471_v14 }
 0x1c4   : > { %545 = vmatpush.msrb.mxu2 %v523_v25  ;;  %565 = vmatpush.msrb.mxu3 %v511_v26  ;;  %v1460_v30 = vpop.permute.xlu1 %1459 }
 0x1c5   : > { %v1462_v32 = vunpack.i.h.bf16 %v1460_v30  ;;  %v1461_v33 = vunpack.i.l.bf16 %v1460_v30  ;;  %v1500_v58 = vpop.permute.xlu0 %1499  ;;  %v1525_v30 = vpop.permute.xlu2 %1524 }
 0x1c6   : > { %546 = vmatpush.msrb.mxu2 %v522_v34  ;;  %566 = vmatpush.msrb.mxu3 %v510_v35  ;;  %v1502_v2 = vunpack.i.h.bf16 %v1500_v58  ;;  %v1501_v3 = vunpack.i.l.bf16 %v1500_v58  ;;  %v1022_v34 = vsel %vm1002_vm8, %v1522_v21, %v1521_v22  ;;  %v846_v35 = vld [vmem:[#allocation2 + $0x28] sm:$0xff] }
 0x1c7   : > { %1289 = vmatmul.msk.f32.vlgmr.msrb.gmra.mxu2 %vm439_vm3, %v527_v31  ;;  %1290 = vmatmul.msk.f32.vlgmr.msrb.gmra.mxu3 %vm439_vm3, %v527_v31  ;;  %v614_v38 = vsel %vm598_vm5, %v1461_v33, %v1462_v32  ;;  %v602_v39 = vsel %vm598_vm5, %v1462_v32, %v1461_v33  ;;  %v1006_v33 = vsel %vm1002_vm8, %v1521_v22, %v1522_v21 }
 0x1c8   : > { %632 = vmatpush.msra.mxu2 %v614_v38  ;;  %652 = vmatpush.msra.mxu3 %v602_v39  ;;  %v828_v15 = vsel %vm824_vm7, %v1501_v3, %v1502_v2  ;;  %v844_v16 = vsel %vm824_vm7, %v1502_v2, %v1501_v3  ;;  %v1482_v38 = vunpack.i.h.bf16 %v1903_v29  ;;  %v1481_v39 = vunpack.i.l.bf16 %v1903_v29  ;;  %v935_v2 = vld [vmem:[#allocation2 + $0x30] sm:$0xff] }
 0x1ca   : > { %633 = vmatpush.msra.mxu2 %v613_v43  ;;  %653 = vmatpush.msra.mxu3 %v601_v44  ;;  %v1527_v43 = vunpack.i.h.bf16 %v1525_v30  ;;  %v1526_v44 = vunpack.i.l.bf16 %v1525_v30  ;;  %v916_v53 = vsel %vm913_vm9, %v1481_v39, %v1482_v38  ;;  %v932_v54 = vsel %vm913_vm9, %v1482_v38, %v1481_v39  ;;  %v483_v30 = vld [vmem:[#allocation5] sm:$0xff]  ;;  %v778_v38 = vpop.f32.mrf.mxu0  ;;  %v798_v39 = vpop.f32.mrf.mxu1 }
 0x1cc   : > { %v1465_v52 = vpop.permute.xlu1 %1464  ;;  %634 = vmatpush.msra.mxu2 %v612_v48  ;;  %654 = vmatpush.msra.mxu3 %v600_v49  ;;  %v1497_v48 = vunpack.i.h.bf16 %v1915_v42  ;;  %v1496_v49 = vunpack.i.l.bf16 %v1915_v42  ;;  %v1019_v42 = vsel %vm1002_vm8, %v1527_v43, %v1526_v44 }
 0x1cd   : > { %v1467_v8 = vunpack.i.h.bf16 %v1465_v52  ;;  %v1466_v9 = vunpack.i.l.bf16 %v1465_v52  ;;  %v1505_v19 = vpop.permute.xlu0 %1504  ;;  %v1540_v3 = vpop.permute.xlu2 %1539 }
 0x1ce   : > { %635 = vmatpush.msra.mxu2 %v611_v56  ;;  %655 = vmatpush.msra.mxu3 %v599_v57  ;;  %v1507_v36 = vunpack.i.h.bf16 %v1505_v19  ;;  %v1506_v37 = vunpack.i.l.bf16 %v1505_v19  ;;  %v1003_v56 = vsel %vm1002_vm8, %v1526_v44, %v1527_v43  ;;  %v915_v60 = vsel %vm913_vm9, %v1496_v49, %v1497_v48 }
 0x1cf   : > { %1291 = vmatmul.msk.f32.vlgmr.msra.gmra.mxu2 %vm439_vm3, %v616_v46  ;;  %1292 = vmatmul.msk.f32.vlgmr.msra.gmra.mxu3 %vm439_vm3, %v616_v46  ;;  %v827_v20 = vsel %vm824_vm7, %v1466_v9, %v1467_v8  ;;  %v843_v55 = vsel %vm824_vm7, %v1467_v8, %v1466_v9  ;;  %v1542_v9 = vunpack.i.h.bf16 %v1540_v3 }
 0x1d0   : > { %721 = vmatpush.msrb.mxu2 %v703_v61  ;;  %741 = vmatpush.msrb.mxu3 %v691_v50  ;;  %v1004_v52 = vsel %vm1002_vm8, %v1506_v37, %v1507_v36  ;;  %v1020_v46 = vsel %vm1002_vm8, %v1507_v36, %v1506_v37  ;;  %v931_v61 = vsel %vm913_vm9, %v1497_v48, %v1496_v49  ;;  %v1024_v50 = vld [vmem:[#allocation2 + $0x38] sm:$0xff]  ;;  %v751_v37 = vld [vmem:[#allocation5 + $0x38] sm:$0xff] }
 0x1d1   : > { %v750_v36 = vld [vmem:[#allocation5 + $0x30] sm:$0xff] }
 0x1d2   : > { %722 = vmatpush.msrb.mxu2 %v702_v0  ;;  %742 = vmatpush.msrb.mxu3 %v690_v1 }
 0x1d4   : > { %723 = vmatpush.msrb.mxu2 %v701_v6  ;;  %743 = vmatpush.msrb.mxu3 %v689_v7  ;;  %v1485_v10 = vpop.permute.xlu1 %1484 }
 0x1d5   : > { %v1487_v4 = vunpack.i.h.bf16 %v1485_v10  ;;  %v1486_v25 = vunpack.i.l.bf16 %v1485_v10  ;;  %v1530_v29 = vpop.permute.xlu0 %1529  ;;  %v1541_v10 = vunpack.i.l.bf16 %v1540_v3 }
 0x1d6   : > { %724 = vmatpush.msrb.mxu2 %v700_v51  ;;  %744 = vmatpush.msrb.mxu3 %v688_v11  ;;  %v1532_v62 = vunpack.i.h.bf16 %v1530_v29  ;;  %v1531_v63 = vunpack.i.l.bf16 %v1530_v29 }
 0x1d7   : > { %1293 = vmatmul.msk.f32.vlgmr.msrb.gmra.mxu2 %vm439_vm3, %v705_v12  ;;  %1294 = vmatmul.msk.f32.vlgmr.msrb.gmra.mxu3 %vm439_vm3, %v705_v12  ;;  %v1005_v45 = vsel %vm1002_vm8, %v1486_v25, %v1487_v4  ;;  %v1021_v47 = vsel %vm1002_vm8, %v1487_v4, %v1486_v25  ;;  %v1109_v17 = vsel %vm1091_vm10, %v1542_v9, %v1541_v10 }
 0x1d8   : > { %862 = vmatpush.msra.mxu2 %v828_v15  ;;  %882 = vmatpush.msra.mxu3 %v844_v16  ;;  %v1095_v5 = vsel %vm1091_vm10, %v1531_v63, %v1532_v62  ;;  %v1111_v6 = vsel %vm1091_vm10, %v1532_v62, %v1531_v63  ;;  %v1093_v16 = vsel %vm1091_vm10, %v1541_v10, %v1542_v9  ;;  %v980_v62 = vld [vmem:[#allocation5 + $0x60] sm:$0xff] }
 0x1da   : > { %863 = vmatpush.msra.mxu2 %v827_v20  ;;  %883 = vmatpush.msra.mxu3 %v843_v55 }
 0x1dc   : > { %864 = vmatpush.msra.mxu2 %v826_v23  ;;  %884 = vmatpush.msra.mxu3 %v842_v24  ;;  %v1510_v26 = vpop.permute.xlu1 %1509 }
 0x1dd   : > { %v1512_v31 = vunpack.i.h.bf16 %v1510_v26  ;;  %v1511_v32 = vunpack.i.l.bf16 %v1510_v26  ;;  %v1545_v7 = vpop.permute.xlu0 %1544 }
 0x1de   : > { %865 = vmatpush.msra.mxu2 %v825_v27  ;;  %885 = vmatpush.msra.mxu3 %v841_v28  ;;  %v1547_v12 = vunpack.i.h.bf16 %v1545_v7  ;;  %v1546_v13 = vunpack.i.l.bf16 %v1545_v7  ;;  %v572_v27 = vld [vmem:[#allocation5 + $0x10] sm:$0xff]  ;;  %v573_v28 = vld [vmem:[#allocation5 + $0x18] sm:$0xff] }
 0x1df   : > { %v917_v40 = vsel %vm913_vm9, %v1511_v32, %v1512_v31  ;;  %v933_v41 = vsel %vm913_vm9, %v1512_v31, %v1511_v32  ;;  %1297 = vmatmul.msk.f32.vlgmr.msra.gmra.mxu2 %vm439_vm3, %v846_v35  ;;  %1298 = vmatmul.msk.f32.vlgmr.msra.gmra.mxu3 %vm439_vm3, %v846_v35  ;;  %v484_v31 = vld [vmem:[#allocation5 + $0x8] sm:$0xff]  ;;  %v661_v32 = vld [vmem:[#allocation5 + $0x20] sm:$0xff]  ;;  %v1070_v7 = vld [vmem:[#allocation5 + $0x78] sm:$0xff] }
 0x1e0   : > { %1040 = vmatpush.msrb.mxu2 %v1006_v33  ;;  %1060 = vmatpush.msrb.mxu3 %v1022_v34  ;;  %v1092_v19 = vsel %vm1091_vm10, %v1546_v13, %v1547_v12  ;;  %v1108_v20 = vsel %vm1091_vm10, %v1547_v12, %v1546_v13  ;;  %v662_v33 = vld [vmem:[#allocation5 + $0x28] sm:$0xff] }
 0x1e1   : > { %951 = vmatpush.msra.mxu0 %v917_v40  ;;  %971 = vmatpush.msra.mxu1 %v933_v41 }
 0x1e2   : > { %1041 = vmatpush.msrb.mxu2 %v1005_v45  ;;  %1061 = vmatpush.msrb.mxu3 %v1021_v47 }
 0x1e3   : > { %952 = vmatpush.msra.mxu0 %v916_v53  ;;  %972 = vmatpush.msra.mxu1 %v932_v54  ;;  %v803_v53 = vld [vmem:[#allocation5 + $0x48] sm:$0xff] }
 0x1e4   : > { %1042 = vmatpush.msrb.mxu2 %v1004_v52  ;;  %1062 = vmatpush.msrb.mxu3 %v1020_v46  ;;  %v1515_v57 = vpop.permute.xlu1 %1514  ;;  %v802_v46 = vld [vmem:[#allocation5 + $0x40] sm:$0xff] }
 0x1e5   : > { %v1517_v58 = vunpack.i.h.bf16 %v1515_v57  ;;  %v1516_v59 = vunpack.i.l.bf16 %v1515_v57  ;;  %953 = vmatpush.msra.mxu0 %v915_v60  ;;  %973 = vmatpush.msra.mxu1 %v931_v61  ;;  %v892_v57 = vld [vmem:[#allocation5 + $0x58] sm:$0xff]  ;;  %v804_v60 = vmul.f32 %v802_v46, %v778_v38  ;;  %v805_v61 = vmul.f32 %v803_v53, %v798_v39 }
 0x1e6   : > { %1043 = vmatpush.msrb.mxu2 %v1003_v56  ;;  %1063 = vmatpush.msrb.mxu3 %v1019_v42  ;;  %v891_v42 = vld [vmem:[#allocation5 + $0x50] sm:$0xff] }
 0x1e7   : > { %v914_v0 = vsel %vm913_vm9, %v1516_v59, %v1517_v58  ;;  %v930_v1 = vsel %vm913_vm9, %v1517_v58, %v1516_v59  ;;  %1301 = vmatmul.msk.f32.vlgmr.msrb.gmra.mxu2 %vm439_vm3, %v1024_v50  ;;  %1302 = vmatmul.msk.f32.vlgmr.msrb.gmra.mxu3 %vm439_vm3, %v1024_v50 }
 0x1e8   : > { %954 = vmatpush.msra.mxu0 %v914_v0  ;;  %974 = vmatpush.msra.mxu1 %v930_v1  ;;  %v981_v0 = vld [vmem:[#allocation5 + $0x68] sm:$0xff] }
 0x1e9   : > { %1299 = vmatmul.msk.f32.vlgmr.msra.gmra.mxu0 %vm439_vm3, %v935_v2  ;;  %1300 = vmatmul.msk.f32.vlgmr.msra.gmra.mxu1 %vm439_vm3, %v935_v2 }
 0x1ea   : > { %1129 = vmatpush.msrb.mxu0 %v1095_v5  ;;  %1149 = vmatpush.msrb.mxu1 %v1111_v6  ;;  %v1069_v5 = vld [vmem:[#allocation5 + $0x70] sm:$0xff] }
 0x1ec   : > { %v1535_v8 = vpop.permute.xlu1 %1534 }
 0x1ed   : > { %v1537_v51 = vunpack.i.h.bf16 %v1535_v8  ;;  %v1536_v11 = vunpack.i.l.bf16 %v1535_v8 }
 0x1ef   : > { %v1094_v14 = vsel %vm1091_vm10, %v1536_v11, %v1537_v51  ;;  %v1110_v15 = vsel %vm1091_vm10, %v1537_v51, %v1536_v11 }
 0x1f0   : > { %1130 = vmatpush.msrb.mxu0 %v1094_v14  ;;  %1150 = vmatpush.msrb.mxu1 %v1110_v15  ;;  %v1158_v15 = vld [vmem:[#allocation5 + $0x80] sm:$0xff] }
 0x1f2   : > { %1131 = vmatpush.msrb.mxu0 %v1093_v16  ;;  %1151 = vmatpush.msrb.mxu1 %v1109_v17  ;;  %v1159_v16 = vld [vmem:[#allocation5 + $0x88] sm:$0xff] }
 0x1f4   : > { %1132 = vmatpush.msrb.mxu0 %v1092_v19  ;;  %1152 = vmatpush.msrb.mxu1 %v1108_v20 }
 0x1f5   : > { %1303 = vmatmul.msk.f32.vlgmr.msrb.gmra.mxu0 %vm439_vm3, %v1113_v18  ;;  %1304 = vmatmul.msk.f32.vlgmr.msrb.gmra.mxu1 %vm439_vm3, %v1113_v18 }
 0x242   : > { %v460_v55 = vpop.f32.mrf.mxu2  ;;  %v480_v21 = vpop.f32.mrf.mxu3 }
 0x243   : > { %v485_v40 = vmul.f32 %v483_v30, %v460_v55  ;;  %v486_v41 = vmul.f32 %v484_v31, %v480_v21 }
 0x24a   : > { %v548_v22 = vpop.f32.mrf.mxu2  ;;  %v568_v23 = vpop.f32.mrf.mxu3 }
 0x24b   : > { %v574_v34 = vmul.f32 %v572_v27, %v548_v22  ;;  %v575_v35 = vmul.f32 %v573_v28, %v568_v23 }
 0x24d   : > { %v576_v48 = vadd.f32 %v574_v34, %v485_v40  ;;  %v577_v49 = vadd.f32 %v575_v35, %v486_v41 }
 0x252   : > { %v637_v24 = vpop.f32.mrf.mxu2  ;;  %v657_v4 = vpop.f32.mrf.mxu3 }
 0x253   : > { %v663_v43 = vmul.f32 %v661_v32, %v637_v24  ;;  %v664_v44 = vmul.f32 %v662_v33, %v657_v4 }
 0x255   : > { %v665_v54 = vadd.f32 %v663_v43, %v576_v48  ;;  %v666_v56 = vadd.f32 %v664_v44, %v577_v49 }
 0x25a   : > { %v726_v25 = vpop.f32.mrf.mxu2  ;;  %v746_v26 = vpop.f32.mrf.mxu3 }
 0x25b   : > { %v752_v29 = vmul.f32 %v750_v36, %v726_v25  ;;  %v753_v52 = vmul.f32 %v751_v37, %v746_v26 }
 0x25d   : > { %v754_v58 = vadd.f32 %v752_v29, %v665_v54  ;;  %v755_v59 = vadd.f32 %v753_v52, %v666_v56 }
 0x25f   : > { %v806_v8 = vadd.f32 %v804_v60, %v754_v58  ;;  %v807_v9 = vadd.f32 %v805_v61, %v755_v59 }
 0x262   : > { %v867_v45 = vpop.f32.mrf.mxu2  ;;  %v887_v47 = vpop.f32.mrf.mxu3 }
 0x263   : > { %v893_v1 = vmul.f32 %v891_v42, %v867_v45  ;;  %v894_v2 = vmul.f32 %v892_v57, %v887_v47 }
 0x265   : > { %v895_v11 = vadd.f32 %v893_v1, %v806_v8  ;;  %v896_v12 = vadd.f32 %v894_v2, %v807_v9 }
 0x266   : > { %v956_v50 = vpop.f32.mrf.mxu0  ;;  %v976_v63 = vpop.f32.mrf.mxu1 }
 0x267   : > { %v982_v10 = vmul.f32 %v980_v62, %v956_v50  ;;  %v983_v51 = vmul.f32 %v981_v0, %v976_v63 }
 0x269   : > { %v984_v17 = vadd.f32 %v982_v10, %v895_v11  ;;  %v985_v18 = vadd.f32 %v983_v51, %v896_v12 }
 0x26a   : > { %v1045_v3 = vpop.f32.mrf.mxu2  ;;  %v1065_v6 = vpop.f32.mrf.mxu3 }
 0x26b   : > { %v1071_v13 = vmul.f32 %v1069_v5, %v1045_v3  ;;  %v1072_v14 = vmul.f32 %v1070_v7, %v1065_v6 }
 0x26d   : > { %v1073_v55 = vadd.f32 %v1071_v13, %v984_v17  ;;  %v1074_v21 = vadd.f32 %v1072_v14, %v985_v18 }
 0x272   : > { %v1134_v19 = vpop.f32.mrf.mxu0  ;;  %v1154_v20 = vpop.f32.mrf.mxu1 }
 0x273   : > { %v1160_v22 = vmul.f32 %v1158_v15, %v1134_v19  ;;  %v1161_v23 = vmul.f32 %v1159_v16, %v1154_v20 }
 0x275   : > { %v1162_v24 = vadd.f32 %v1160_v22, %v1073_v55  ;;  %v1163_v4 = vadd.f32 %v1161_v23, %v1074_v21 }
 0x277   : > { %1164 = vst [vmem:[%s1819_s20 + $0x10] sm:$0xff] %v1162_v24 }
 0x278   : > { %1165 = vst [vmem:[%s1819_s20 + $0x18] sm:$0xff] %v1163_v4 }
 0x279   : > { %1635 = shalt.err (!%p1632_p8)
}
 0x27a   : > { %s1696_s14 = smov 256  }
 0x27b   : > { %1320 = dma.vmem_to_hbm [thread:$0]  (%p1770_p5), %s1180_s13, 512, %s1182_s25, %s1167_s15, %s1696_s14, %s1696_s14, %s1689_s16  }
 0x27c PF: > { %p1337_p9 = scmp.ge.s32.totalorder %s1678_s24, 2  ;;  %s1196_s20 = sand.u32 1, %s1666_s21  }
 0x27d   : > { %s1197_s10 = scalar_lea.sflag [#allocation4], %s1196_s20 }
 0x27e   : > { %p1330_p10 = pnand %p1337_p9, %p1774_p6 }
 0x280   : > { %p1331_p11 = pneg %p1330_p10 }
 0x282   : > { %1661 = dma.done.wait (%p1331_p11), %s1197_s10, 512  }
 0x283   : > { %1663 = vsyncadd (%p1331_p11), %s1197_s10, 4294966784  ;;  %p18_p12 = scmp.ge.s32.totalorder %s1757_s27, 4   ;;  %s2038_s21 = smov %s1670_s22 }
 0x284   : > { %s2039_s22 = smov %s1674_s23  ;;  %s2040_s23 = smov %s1768_s30 }
 0x285   : > { %s2041_s24 = smov %s1757_s27  ;;  %20 = sbr.rel (!%p18_p12) target bundleno = 5 (0x5), region = 104 }
 0x28a   :  { %1203 = vsyncpa [#allocation3], 1 }
 0x28b   :  { %1205 = vsyncpa [#allocation3 + $0x1], 1 }
 0x28c   :  { %1206 = vsyncpa [#allocation6], 1 }
 0x28d   :  { %1207 = vsyncpa [#allocation4], 1 }
 0x28e   :  { %1209 = vsyncpa [#allocation4 + $0x1], 1 }

</bundles_post_ra>
